<compile_context>
chip_gen: v7x
topology: tpu7x:2x2x1
jax: 0.10.0
libtpu: 0.0.40
codegen_flags: <defaults>
</compile_context>

<pallas_src>
import functools

import jax
import jax.numpy as jnp
import numpy as np
from jax.experimental import pallas as pl
from jax.experimental.pallas import tpu as pltpu

_LAMBDA_OFFDIAG = 0.0051


def _round_up(x: int, m: int) -> int:
    return ((x + m - 1) // m) * m


def _pick_tile(dim: int, align: int, max_tile: int) -> int:
    """Largest multiple of `align` that divides `dim` and is <= max_tile.

    Callers always pad `dim` to a multiple of `align` first, so this always
    succeeds (worst case returns `align`); no full-dimension fallback cliff."""
    t = min(dim, max_tile)
    t -= t % align
    while t >= align:
        if dim % t == 0:
            return t
        t -= align
    return dim  # unreachable after padding; kept as a harmless fallback


# --------------------------- Stage 1a: column stats ---------------------------

def _stats_kernel(z_ref, sum_ref, sumsq_ref):
    @pl.when(pl.program_id(1) == 0)
    def _():
        sum_ref[...] = jnp.zeros_like(sum_ref)
        sumsq_ref[...] = jnp.zeros_like(sumsq_ref)

    z = z_ref[...]
    sum_ref[...] += jnp.sum(z, axis=0, keepdims=True)
    sumsq_ref[...] += jnp.sum(z * z, axis=0, keepdims=True)


# --------------------------- Stage 1b: normalize ------------------------------

def _normalize_kernel(z_ref, ms_ref, zn_ref, *, n_true: int, tn: int, mask_rows: bool):
    z = z_ref[...]
    mean = ms_ref[0:1, :]   # (1, tD)
    scale = ms_ref[1:2, :]  # (1, tD)   rsqrt(var) * 1/sqrt(bsz), 0 for padded cols
    zn = (z - mean) * scale
    if mask_rows:
        row = pl.program_id(0) * tn + jax.lax.broadcasted_iota(jnp.int32, z.shape, 0)
        zn = jnp.where(row < n_true, zn, 0.0)
    zn_ref[...] = zn.astype(zn_ref.dtype)


# ------------------- Stage 2: symmetric Gram + loss epilogue -------------------

def _gram_loss_kernel(i_ids_ref, j_ids_ref, zi_ref, zj_ref, out_ref, acc_ref, *, lam: float):
    p = pl.program_id(0)
    k = pl.program_id(1)
    nk = pl.num_programs(1)

    @pl.when(k == 0)
    def _():
        acc_ref[...] = jnp.zeros_like(acc_ref)

    # C[i-tile, j-tile] += Zn[k-rows, i-cols]^T @ Zn[k-rows, j-cols]  (bf16 in, f32 acc).
    # dim-0/dim-0 contraction is the same pattern production flash-attention bwd
    # uses; it stays on the MXU.
    acc_ref[...] += jax.lax.dot_general(
        zi_ref[...], zj_ref[...],
        dimension_numbers=(((0,), (0,)), ((), ())),
        preferred_element_type=jnp.float32,
    )

    is_last = k == nk - 1
    is_diag = i_ids_ref[p] == j_ids_ref[p]

    @pl.when(is_last & jnp.logical_not(is_diag))
    def _():
        c = acc_ref[...]
        # Strict upper-triangular tile: its (j, i) mirror has the same sum of
        # squares, so double it here and never visit the mirror.
        out_ref[0, :, :] = (2.0 * lam) * jnp.sum(c * c, axis=0, keepdims=True)

    @pl.when(is_last & is_diag)
    def _():
        c = acc_ref[...]
        td = c.shape[0]
        eye = (jax.lax.broadcasted_iota(jnp.int32, (td, td), 0)
               == jax.lax.broadcasted_iota(jnp.int32, (td, td), 1))
        contrib = lam * (c * c) + jnp.where(
            eye, (c - 1.0) * (c - 1.0) - lam * (c * c), 0.0)
        out_ref[0, :, :] = jnp.sum(contrib, axis=0, keepdims=True)


# ------------------------------- wrapper ---------------------------------------

def barlow_quads_loss(features: jax.Array, *, d_tile: int = 512, n_tile: int = 1024,
                      stat_d_tile: int = 512, stat_n_tile: int = 1024) -> jax.Array:
    """features: [bsz, n_views, ...]; trailing dims are flattened to D."""
    if features.ndim < 3:
        raise ValueError("`features` needs to be [bsz, n_views, ...], "
                         "at least 3 dimensions are required")
    bsz, n_views = features.shape[0], features.shape[1]
    feats = features.reshape(bsz, n_views, -1)
    d = feats.shape[-1]
    n = bsz * n_views
    if n < 2:
        raise ValueError("bsz * n_views must be >= 2 (unbiased std needs N-1 > 0)")

    # torch.cat(torch.unbind(features, 1), 0) is only a row permutation of
    # features.reshape(N, D); column stats and the Gram are row-permutation
    # invariant, so the views-major transpose (a full HBM copy) is skipped.
    z = feats.reshape(n, d).astype(jnp.float32)

    # Pad so every tile is (16, 128)-aligned (bf16 sublane x lane) and _pick_tile
    # always finds an aligned divisor.
    d_pad = _round_up(d, 128)
    n_pad = _round_up(n, 16)
    if d_pad != d or n_pad != n:
        z = jnp.pad(z, ((0, n_pad - n), (0, d_pad - d)))

    td1 = _pick_tile(d_pad, 128, stat_d_tile)
    tn1 = _pick_tile(n_pad, 16, stat_n_tile)
    num_d1 = d_pad // td1
    num_n1 = n_pad // tn1

    # ---- Stage 1a: per-column sum / sum-of-squares (resident accumulators). ----
    col_sum, col_sumsq = pl.pallas_call(
        _stats_kernel,
        out_shape=(jax.ShapeDtypeStruct((1, d_pad), jnp.float32),
                   jax.ShapeDtypeStruct((1, d_pad), jnp.float32)),
        grid=(num_d1, num_n1),
        in_specs=[pl.BlockSpec((tn1, td1), lambda dc, nc: (nc, dc))],
        out_specs=(pl.BlockSpec((1, td1), lambda dc, nc: (0, dc)),
                   pl.BlockSpec((1, td1), lambda dc, nc: (0, dc))),
        compiler_params=pltpu.CompilerParams(
            dimension_semantics=("parallel", "arbitrary")),
    )(z)

    # ---- Tiny JAX epilogue: mean + folded per-column scale. ----
    inv_sqrt_bsz = float(1.0 / np.sqrt(bsz))
    mean = col_sum / float(n)
    var = (col_sumsq - float(n) * mean * mean) / float(n - 1)   # unbiased (torch.std)
    scale = jax.lax.rsqrt(var) * inv_sqrt_bsz
    if d_pad != d:
        scale = jnp.where(jnp.arange(d_pad)[None, :] < d, scale, 0.0)
    ms = jnp.concatenate([mean, scale], axis=0)                 # (2, d_pad)

    # ---- Stage 1b: normalize, fold 1/sqrt(bsz), emit bf16 for the MXU. ----
    zn = pl.pallas_call(
        functools.partial(_normalize_kernel, n_true=n, tn=tn1, mask_rows=(n_pad != n)),
        out_shape=jax.ShapeDtypeStruct((n_pad, d_pad), jnp.bfloat16),
        grid=(num_n1, num_d1),
        in_specs=[pl.BlockSpec((tn1, td1), lambda nc, dc: (nc, dc)),
                  pl.BlockSpec((2, td1), lambda nc, dc: (0, dc))],
        out_specs=pl.BlockSpec((tn1, td1), lambda nc, dc: (nc, dc)),
        compiler_params=pltpu.CompilerParams(
            dimension_semantics=("parallel", "parallel")),
    )(z, ms)

    # ---- Stage 2: upper-triangular (i <= j) Gram tiles + slim loss epilogue. ----
    td = _pick_tile(d_pad, 128, d_tile)
    tn = _pick_tile(n_pad, 16, n_tile)
    num_d = d_pad // td
    num_k = n_pad // tn

    pair_i, pair_j = [], []
    for i in range(num_d):
        for j in range(i, num_d):
            pair_i.append(i)
            pair_j.append(j)
    num_pairs = len(pair_i)
    i_ids = jnp.asarray(pair_i, dtype=jnp.int32)
    j_ids = jnp.asarray(pair_j, dtype=jnp.int32)

    partials = pl.pallas_call(
        functools.partial(_gram_loss_kernel, lam=_LAMBDA_OFFDIAG),
        out_shape=jax.ShapeDtypeStruct((num_pairs, 1, td), jnp.float32),
        grid_spec=pltpu.PrefetchScalarGridSpec(
            num_scalar_prefetch=2,
            grid=(num_pairs, num_k),
            in_specs=[pl.BlockSpec((tn, td), lambda p, k, ii, jj: (k, ii[p])),
                      pl.BlockSpec((tn, td), lambda p, k, ii, jj: (k, jj[p]))],
            out_specs=pl.BlockSpec((1, 1, td), lambda p, k, ii, jj: (p, 0, 0)),
            scratch_shapes=[pltpu.VMEM((td, td), jnp.float32)]),
        compiler_params=pltpu.CompilerParams(
            dimension_semantics=("parallel", "arbitrary")),
    )(i_ids, j_ids, zn, zn)

    loss = jnp.sum(partials)
    if d_pad != d:
        # Each padded all-zero column contributes exactly (0 - 1)^2 = 1 on the
        # diagonal and 0 off-diagonal.
        loss = loss - float(d_pad - d)
    return loss


# ----------------------------- references -----------------------------

def _reference_f32(features: jax.Array) -> jax.Array:
    """Pure-f32 JAX mirror of the PyTorch forward (mode='all', adv=False)."""
    bsz, n_views = features.shape[0], features.shape[1]
    feats = features.reshape(bsz, n_views, -1)
    z = jnp.transpose(feats, (1, 0, 2)).reshape(bsz * n_views, -1).astype(jnp.float32)
    mean = z.mean(axis=0)
    std = jnp.sqrt(jnp.sum((z - mean) ** 2, axis=0) / (z.shape[0] - 1))
    zn = (z - mean) / std
    c = (zn.T @ zn) / bsz
    diag = jnp.diagonal(c)
    on_diag = jnp.sum((diag - 1.0) ** 2)
    off_diag = jnp.sum(c ** 2) - jnp.sum(diag ** 2)
    return on_diag + _LAMBDA_OFFDIAG * off_diag


def _reference_bf16(features: jax.Array) -> jax.Array:
    """Reference using the same precision path as the kernels (f32 stats, bf16 MXU)."""
    bsz, n_views = features.shape[0], features.shape[1]
    feats = features.reshape(bsz, n_views, -1)
    z = feats.reshape(bsz * n_views, -1).astype(jnp.float32)
    n = z.shape[0]
    s = jnp.sum(z, axis=0, keepdims=True)
    sq = jnp.sum(z * z, axis=0, keepdims=True)
    mean = s / n
    var = (sq - n * mean * mean) / (n - 1)
    scale = jax.lax.rsqrt(var) * float(1.0 / np.sqrt(bsz))
    zn = ((z - mean) * scale).astype(jnp.bfloat16)
    c = jax.lax.dot_general(zn, zn, (((0,), (0,)), ((), ())),
                            preferred_element_type=jnp.float32)
    diag = jnp.diagonal(c)
    return (jnp.sum((diag - 1.0) ** 2)
            + _LAMBDA_OFFDIAG * (jnp.sum(c * c) - jnp.sum(diag * diag)))


if __name__ == "__main__":
    key = jax.random.PRNGKey(0)
    k1, k2, k3 = jax.random.split(key, 3)

    # Config 1: multi-tile symmetric path (num_d=2 -> 3 pairs, num_k=2): N=32, D=256.
    feats1 = jax.random.normal(k1, (16, 2, 256), dtype=jnp.float32)
    loss1 = jax.block_until_ready(barlow_quads_loss(feats1, d_tile=128, n_tile=16))
    np.testing.assert_allclose(np.asarray(loss1), np.asarray(_reference_bf16(feats1)),
                               rtol=5e-3, atol=5e-2)
    np.testing.assert_allclose(np.asarray(loss1), np.asarray(_reference_f32(feats1)),
                               rtol=5e-2, atol=5e-1)

    # Config 2: 4-D features, N=8 (row padding to 16 exercised), D=8*16=128.
    feats2 = jax.random.normal(k2, (4, 2, 8, 16), dtype=jnp.float32)
    loss2 = jax.block_until_ready(barlow_quads_loss(feats2))
    np.testing.assert_allclose(np.asarray(loss2), np.asarray(_reference_bf16(feats2)),
                               rtol=5e-3, atol=5e-2)
    np.testing.assert_allclose(np.asarray(loss2), np.asarray(_reference_f32(feats2)),
                               rtol=5e-2, atol=5e-1)

    # Config 3: ragged D=50 (column padding + diagonal correction), N=18.
    feats3 = jax.random.normal(k3, (6, 3, 5, 10), dtype=jnp.float32)
    loss3 = jax.block_until_ready(barlow_quads_loss(feats3))
    np.testing.assert_allclose(np.asarray(loss3), np.asarray(_reference_bf16(feats3)),
                               rtol=5e-3, atol=5e-2)
    np.testing.assert_allclose(np.asarray(loss3), np.asarray(_reference_f32(feats3)),
                               rtol=5e-2, atol=5e-1)

    print("KERNEL_OK")
</pallas_src>

<mosaic_0001>
module attributes {stable_mosaic.version = 11 : i64} {
  func.func @_stats_kernel(%arg0: i32, %arg1: i32, %arg2: memref<32x256xf32, #tpu.memory_space<vmem>>, %arg3: memref<1x256xf32, #tpu.memory_space<vmem>>, %arg4: memref<1x256xf32, #tpu.memory_space<vmem>>) attributes {dimension_semantics = [#tpu.dimension_semantics<parallel>, #tpu.dimension_semantics<arbitrary>], iteration_bounds = array<i64: 1, 1>, scalar_prefetch = 0 : i64, scratch_operands = 0 : i64, tpu.core_type = #tpu.core_type<tc>, window_params = [{transform_indices = @transform_0, window_bounds = array<i64: 32, 256>}, {transform_indices = @transform_1, window_bounds = array<i64: 1, 256>}, {transform_indices = @transform_2, window_bounds = array<i64: 1, 256>}]} {
    %c0_i32 = arith.constant 0 : i32
    %0 = arith.cmpi eq, %arg1, %c0_i32 : i32
    %1 = arith.extui %0 : i1 to i32
    %c0_i32_0 = arith.constant 0 : i32
    %2 = arith.cmpi ne, %1, %c0_i32_0 : i32
    scf.if %2 {
      %cst_11 = arith.constant 0.000000e+00 : f32
      %15 = vector.broadcast %cst_11 : f32 to vector<1x256xf32>
      %c0_12 = arith.constant 0 : index
      %c0_13 = arith.constant 0 : index
      %16 = vector.load %arg3[%c0_12, %c0_13] : memref<1x256xf32, #tpu.memory_space<vmem>>, vector<1x256xf32>
      tpu.vector_store %arg3[%c0_12, %c0_13], %15 {strides = array<i32>} : memref<1x256xf32, #tpu.memory_space<vmem>>, vector<1x256xf32>,
      %cst_14 = arith.constant 0.000000e+00 : f32
      %17 = vector.broadcast %cst_14 : f32 to vector<1x256xf32>
      %c0_15 = arith.constant 0 : index
      %c0_16 = arith.constant 0 : index
      %18 = vector.load %arg4[%c0_15, %c0_16] : memref<1x256xf32, #tpu.memory_space<vmem>>, vector<1x256xf32>
      tpu.vector_store %arg4[%c0_15, %c0_16], %17 {strides = array<i32>} : memref<1x256xf32, #tpu.memory_space<vmem>>, vector<1x256xf32>,
    } else {
    }
    %c0 = arith.constant 0 : index
    %c0_1 = arith.constant 0 : index
    %3 = vector.load %arg2[%c0, %c0_1] : memref<32x256xf32, #tpu.memory_space<vmem>>, vector<32x256xf32>
    %c0_2 = arith.constant 0 : index
    %c0_3 = arith.constant 0 : index
    %4 = vector.load %arg3[%c0_2, %c0_3] : memref<1x256xf32, #tpu.memory_space<vmem>>, vector<1x256xf32>
    %cst = arith.constant dense<0.000000e+00> : vector<256xf32>
    %5 = vector.multi_reduction <add>, %3, %cst [0] : vector<32x256xf32> to vector<256xf32>
    %6 = vector.shape_cast %5 : vector<256xf32> to vector<1x256xf32>
    %7 = arith.addf %4, %6 : vector<1x256xf32>
    %c0_4 = arith.constant 0 : index
    %c0_5 = arith.constant 0 : index
    %8 = vector.load %arg3[%c0_4, %c0_5] : memref<1x256xf32, #tpu.memory_space<vmem>>, vector<1x256xf32>
    tpu.vector_store %arg3[%c0_4, %c0_5], %7 {strides = array<i32>} : memref<1x256xf32, #tpu.memory_space<vmem>>, vector<1x256xf32>,
    %c0_6 = arith.constant 0 : index
    %c0_7 = arith.constant 0 : index
    %9 = vector.load %arg4[%c0_6, %c0_7] : memref<1x256xf32, #tpu.memory_space<vmem>>, vector<1x256xf32>
    %10 = arith.mulf %3, %3 : vector<32x256xf32>
    %cst_8 = arith.constant dense<0.000000e+00> : vector<256xf32>
    %11 = vector.multi_reduction <add>, %10, %cst_8 [0] : vector<32x256xf32> to vector<256xf32>
    %12 = vector.shape_cast %11 : vector<256xf32> to vector<1x256xf32>
    %13 = arith.addf %9, %12 : vector<1x256xf32>
    %c0_9 = arith.constant 0 : index
    %c0_10 = arith.constant 0 : index
    %14 = vector.load %arg4[%c0_9, %c0_10] : memref<1x256xf32, #tpu.memory_space<vmem>>, vector<1x256xf32>
    tpu.vector_store %arg4[%c0_9, %c0_10], %13 {strides = array<i32>} : memref<1x256xf32, #tpu.memory_space<vmem>>, vector<1x256xf32>,
    return
  }
  func.func @transform_0(%arg0: i32, %arg1: i32) -> (i32, i32) {
    %c0_i32 = arith.constant 0 : i32
    return %arg1, %arg0 : i32, i32
  }
  func.func @transform_1(%arg0: i32, %arg1: i32) -> (i32, i32) {
    %c0_i32 = arith.constant 0 : i32
    %c0_i32_0 = arith.constant 0 : i32
    return %c0_i32, %arg0 : i32, i32
  }
  func.func @transform_2(%arg0: i32, %arg1: i32) -> (i32, i32) {
    %c0_i32 = arith.constant 0 : i32
    %c0_i32_0 = arith.constant 0 : i32
    return %c0_i32, %arg0 : i32, i32
  }
}

</mosaic_0001>

<bundles_post_ra>
// kernel: tpu_custom_call.1
= control target key start
LH: loop header
LB: loop body
LE: loop exit
PB: predicated region body
PF: predicated region fallthrough
CT: control target
= control target key end

     0   :  { %8 = vsyncpa [#allocation3], 0  ;;  %s312_s0 = inlined_call_operand.hbm [shape: f32[32,256], index: 0, kind: input, shape index: {}]   ;;  %s313_s1 = inlined_call_operand.hbm [shape: f32[1,256], index: 1, kind: output, shape index: {0}]   ;;  %s314_s2 = inlined_call_operand.hbm [shape: f32[1,256], index: 2, kind: output, shape index: {1}]  }
   0x1   :  { %9 = vsyncpa [#allocation4], 0 }
   0x2   :  { %10 = vsyncpa [#allocation7], 0  ;;  %s242_s9 = smov [#allocation2]   ;;  %s170_s13 = scalar_lea.hbm %s312_s0, 1024 }
   0x3   :  { %s16_s10 = sshll.u32 %s242_s9, 4  ;;  %p171_p0 = scmp.ne.s32.totalorder %s312_s0, %s170_s13  ;;  %s17_s10 = int_to_ptr.vmem [resolvable:$true] %s16_s10 }
   0x4   :  { %p174_p1 = scmp.lt.u32.totalorder %s170_s13, %s312_s0 }
   0x6   :  { %p176_p2 = pnand %p174_p1, %p171_p0 }
   0x8   :  { %179 = shalt.err (!%p176_p2)
}
   0x9   :  { %s180_s18 = scalar_lea.vmem %s17_s10, 1024  ;;  %p185_p4 = scmp.lt.s32.totalorder %s17_s10, %s17_s10 }
   0xa   :  { %p181_p3 = scmp.ne.s32.totalorder %s17_s10, %s180_s18  ;;  %p186_p5 = scmp.lt.s32.totalorder %s180_s18, %s180_s18 }
   0xc   :  { %p187_p6 = por %p186_p5, %p185_p4 }
   0xe   :  { %p188_p7 = pnand %p187_p6, %p181_p3 }
  0x10   :  { %191 = shalt.err (!%p188_p7)
}
  0x11   :  { %s243_s19 = smov 256   ;;  %s244_s20 = smov 16  }
  0x12   :  { %22 = dma.hbm_to_vmem [thread:$0]  %s312_s0, 1024, %s17_s10, [#allocation3], %s243_s19, %s243_s19, %s244_s20  }
  0x13   :  { %236 = dma.done.wait [#allocation3], 1024  }
  0x14   :  { %237 = vsyncadd [#allocation3], 4294966272  ;;  %v30_v0 = vlaneseq  ;;  %v245_v2 = vmov 0.0   ;;  %v36_v3 = vld [vmem:[#allocation2] sm:$0xff]  ;;  %v37_v4 = vld [vmem:[#allocation2 + $0x8] sm:$0xff]  ;;  %s247_s0 = smov [#allocation5]  }
  0x15   :  { %v38_v5 = vld [vmem:[#allocation2 + $0x10] sm:$0xff]  ;;  %v39_v6 = vld [vmem:[#allocation2 + $0x18] sm:$0xff]  ;;  %v40_v7 = vld [vmem:[#allocation2 + $0x20] sm:$0xff]  ;;  %v88_v10 = vmul.f32 %v36_v3, %v36_v3  ;;  %v89_v11 = vmul.f32 %v37_v4, %v37_v4  ;;  %v246_v35 = vmov 1966171168   ;;  %s140_s23 = sshll.u32 %s247_s0, 4  ;;  %s141_s23 = int_to_ptr.vmem [resolvable:$true] %s140_s23 }
  0x16   :  { %vm276_vm0 = vcmp.lt.s32.totalorder %v30_v0, 256  ;;  %v41_v8 = vld [vmem:[#allocation2 + $0x28] sm:$0xff]  ;;  %v45_v9 = vadd.f32 %v38_v5, %v36_v3  ;;  %v90_v12 = vmul.f32 %v38_v5, %v38_v5  ;;  %v42_v13 = vld [vmem:[#allocation2 + $0x30] sm:$0xff]  ;;  %v43_v14 = vld [vmem:[#allocation2 + $0x38] sm:$0xff]  ;;  %v54_v15 = vadd.f32 %v39_v6, %v37_v4  ;;  %s248_s24 = smov [#allocation6]   ;;  %s192_s26 = scalar_lea.vmem %s141_s23, 32 }
  0x17   :  { %34 = vst.msk [vmem:[#allocation5] sm:$0x3] %vm276_vm0, %v245_v2  ;;  %35 = vst.msk [vmem:[#allocation6] sm:$0x3] %vm276_vm0, %v245_v2  ;;  %v91_v16 = vmul.f32 %v39_v6, %v39_v6  ;;  %v92_v17 = vmul.f32 %v40_v7, %v40_v7  ;;  %v93_v18 = vmul.f32 %v41_v8, %v41_v8  ;;  %v67_v36 = vunpack.c.l.s4 %v246_v35  ;;  %s150_s25 = sshll.u32 %s248_s24, 4  ;;  %p193_p8 = scmp.ne.s32.totalorder %s141_s23, %s192_s26  ;;  %s151_s25 = int_to_ptr.vmem [resolvable:$true] %s150_s25 }
  0x18   :  { %v46_v19 = vadd.f32 %v45_v9, %v40_v7  ;;  %v94_v20 = vmul.f32 %v42_v13, %v42_v13  ;;  %v96_v21 = vadd.f32 %v90_v12, %v88_v10  ;;  %v55_v22 = vadd.f32 %v54_v15, %v41_v8  ;;  %p197_p9 = scmp.lt.s32.totalorder %s141_s23, %s141_s23  ;;  %p198_p10 = scmp.lt.s32.totalorder %s192_s26, %s192_s26 }
  0x19   :  { %v95_v23 = vmul.f32 %v43_v14, %v43_v14  ;;  %v105_v24 = vadd.f32 %v91_v16, %v89_v11  ;;  %v68_v45 = vunpack.c.0.s8 %v67_v36  ;;  %v70_v46 = vshrl.u32 %v30_v0, 7 }
  0x1a   :  { %v47_v25 = vadd.f32 %v46_v19, %v42_v13  ;;  %v97_v26 = vadd.f32 %v96_v21, %v92_v17  ;;  %v56_v27 = vadd.f32 %v55_v22, %v43_v14  ;;  %p199_p11 = por %p198_p10, %p197_p9 }
  0x1b   :  { %v106_v28 = vadd.f32 %v105_v24, %v93_v18  ;;  %v71_v55 = vsub.s32 %v68_v45, %v70_v46 }
  0x1c   :  { %v48_v29 = vrot.slane %v47_v25, 4  ;;  %v98_v30 = vadd.f32 %v97_v26, %v94_v20  ;;  %v57_v31 = vrot.slane %v56_v27, 4  ;;  %p200_p12 = pnand %p199_p11, %p193_p8 }
  0x1d   :  { %v107_v32 = vadd.f32 %v106_v28, %v95_v23 }
  0x1e   :  { %v49_v33 = vadd.f32 %v48_v29, %v47_v25  ;;  %v99_v34 = vrot.slane %v98_v30, 4  ;;  %v58_v37 = vadd.f32 %v57_v31, %v56_v27  ;;  %v44_v63 = vld [vmem:[#allocation5] sm:$0x3]  ;;  %v87_v3 = vld [vmem:[#allocation6] sm:$0x3] }
  0x1f   :  { %v108_v38 = vrot.slane %v107_v32, 4 }
  0x20   :  { %v50_v39 = vrot.slane %v49_v33, 2  ;;  %v100_v40 = vadd.f32 %v99_v34, %v98_v30  ;;  %v59_v41 = vrot.slane %v58_v37, 2 }
  0x21   :  { %v109_v42 = vadd.f32 %v108_v38, %v107_v32 }
  0x22   :  { %v51_v43 = vadd.f32 %v50_v39, %v49_v33  ;;  %v101_v44 = vrot.slane %v100_v40, 2  ;;  %v60_v47 = vadd.f32 %v59_v41, %v58_v37 }
  0x23   :  { %v110_v48 = vrot.slane %v109_v42, 2 }
  0x24   :  { %v52_v49 = vrot.slane %v51_v43, 1  ;;  %v102_v50 = vadd.f32 %v101_v44, %v100_v40  ;;  %v61_v51 = vrot.slane %v60_v47, 1 }
  0x25   :  { %v111_v52 = vadd.f32 %v110_v48, %v109_v42 }
  0x26   :  { %v53_v53 = vadd.f32 %v52_v49, %v51_v43  ;;  %v103_v54 = vrot.slane %v102_v50, 1  ;;  %v62_v56 = vadd.f32 %v61_v51, %v60_v47 }
  0x27   :  { %v112_v57 = vrot.slane %v111_v52, 1 }
  0x28   :  { %v104_v58 = vadd.f32 %v103_v54, %v102_v50  ;;  %v65_v59 = vcombine.low %v53_v53, %v62_v56 }
  0x29   :  { %v113_v60 = vadd.f32 %v112_v57, %v111_v52 }
  0x2a   :  { %v72_v61 = vrot.slane %v65_v59, %v71_v55 }
  0x2b   :  { %v116_v62 = vcombine.low %v104_v58, %v113_v60 }
  0x2c   :  { %v79_v0 = vrot.slane %v72_v61, %v71_v55 }
  0x2d   :  { %v123_v2 = vrot.slane %v116_v62, %v71_v55 }
  0x2e   :  { %v81_v4 = vadd.f32 %v79_v0, %v44_v63 }
  0x2f   :  { %v130_v5 = vrot.slane %v123_v2, %v71_v55 }
  0x30   :  { %86 = vst.msk [vmem:[#allocation5] sm:$0x3] %vm276_vm0, %v81_v4 }
  0x31   :  { %v132_v6 = vadd.f32 %v130_v5, %v87_v3 }
  0x32   :  { %203 = shalt.err (!%p200_p12)
}
  0x33   :  { %s204_s29 = scalar_lea.hbm %s313_s1, 32 }
  0x34   :  { %p205_p13 = scmp.ne.s32.totalorder %s313_s1, %s204_s29  ;;  %p208_p0 = scmp.lt.u32.totalorder %s204_s29, %s313_s1 }
  0x36   :  { %p210_p1 = pnand %p208_p0, %p205_p13 }
  0x38   :  { %213 = shalt.err (!%p210_p1)
}
  0x39   :  { %143 = dma.vmem_to_hbm [thread:$0]  %s141_s23, 32, %s313_s1, [#allocation4]   ;;  %133 = vst.msk [vmem:[#allocation6] sm:$0x3] %vm276_vm0, %v132_v6 }
  0x3a   :  { %s214_s8 = scalar_lea.vmem %s151_s25, 32  ;;  %p219_p3 = scmp.lt.s32.totalorder %s151_s25, %s151_s25 }
  0x3b   :  { %p215_p2 = scmp.ne.s32.totalorder %s151_s25, %s214_s8  ;;  %p220_p4 = scmp.lt.s32.totalorder %s214_s8, %s214_s8 }
  0x3d   :  { %p221_p5 = por %p220_p4, %p219_p3 }
  0x3f   :  { %p222_p6 = pnand %p221_p5, %p215_p2 }
  0x41   :  { %225 = shalt.err (!%p222_p6)
}
  0x42   :  { %s226_s11 = scalar_lea.hbm %s314_s2, 32 }
  0x43   :  { %p227_p7 = scmp.ne.s32.totalorder %s314_s2, %s226_s11  ;;  %p230_p8 = scmp.lt.u32.totalorder %s226_s11, %s314_s2 }
  0x45   :  { %p232_p9 = pnand %p230_p8, %p227_p7 }
  0x47   :  { %235 = shalt.err (!%p232_p9)
}
  0x48   :  { %153 = dma.vmem_to_hbm [thread:$0]  %s151_s25, 32, %s314_s2, [#allocation7]  }
  0x49   :  { %238 = dma.done.wait [#allocation4], 32  }
  0x4a   :  { %239 = vsyncadd [#allocation4], 4294967264 }
  0x4b   :  { %240 = dma.done.wait [#allocation7], 32  }
  0x4c   :  { %241 = vsyncadd [#allocation7], 4294967264 }
  0x4d   :  { %160 = vsyncpa [#allocation3], 1 }
  0x4e   :  { %161 = vsyncpa [#allocation4], 1 }
  0x4f   :  { %162 = vsyncpa [#allocation7], 1 }

</bundles_post_ra>
